<compile_context>
chip_gen: v6e
topology: v6e:2x2x1
jax: 0.10.0
libtpu: 0.0.40
codegen_flags: <defaults>
</compile_context>

<pallas_src>
import functools
import jax
import jax.numpy as jnp
from jax.experimental import pallas as pl
from jax.experimental.pallas import tpu as pltpu


# ------------------------------ kernels -------------------------------------

def _classifier_kernel(inv_n, x_ref, cls_ref, w_ref, b_ref, o_ref, acc_ref):
    """Fused mean-pool(seq) + cls residual + linear head."""
    k = pl.program_id(1)

    @pl.when(k == 0)
    def _():
        acc_ref[...] = jnp.zeros_like(acc_ref)

    # f32-accumulated partial sum over this sequence chunk (widen fused into
    # the reduction; no explicit full-tile astype copy).
    acc_ref[...] += jnp.sum(x_ref[...], axis=1, dtype=jnp.float32)

    @pl.when(k == pl.num_programs(1) - 1)
    def _():
        pooled = acc_ref[...] * inv_n                                   # (tb, C)
        y = pooled + jnp.squeeze(cls_ref[...], axis=1).astype(jnp.float32)
        logits = jnp.dot(y, w_ref[...], preferred_element_type=jnp.float32)
        logits = logits + b_ref[...].astype(jnp.float32)                # (tb, Kp)
        o_ref[...] = logits[:, None, :].astype(o_ref.dtype)             # (tb,1,Kp)


def _pool_residual_kernel(inv_n, x_ref, cls_ref, o_ref, acc_ref):
    """num_classes <= 0 branch (nn.Identity head): pooled + cls."""
    k = pl.program_id(1)

    @pl.when(k == 0)
    def _():
        acc_ref[...] = jnp.zeros_like(acc_ref)

    acc_ref[...] += jnp.sum(x_ref[...], axis=1, dtype=jnp.float32)

    @pl.when(k == pl.num_programs(1) - 1)
    def _():
        y = acc_ref[...] * inv_n + jnp.squeeze(cls_ref[...], axis=1).astype(jnp.float32)
        o_ref[...] = y[:, None, :].astype(o_ref.dtype)


# ----------------------------- heuristics ------------------------------------

def _vmem_capacity_bytes():
    try:
        return int(pltpu.get_tpu_info().vmem_capacity_bytes)
    except Exception:
        return 64 << 20          # conservative fallback (v7x per-TensorCore VMEM)


def _num_tensorcores():
    # v7x has 2 TensorCores per chip; v5e / v6e have 1.
    try:
        kind = jax.devices()[0].device_kind.lower()
        if "v7" in kind:
            return 2
    except Exception:
        pass
    return 1


def _largest_divisor_leq(n, cap):
    cap = max(1, min(n, cap))
    for d in range(cap, 0, -1):
        if n % d == 0:
            return d
    return 1


def _choose_tiles(B, N, C, x_itemsize):
    """Generation-aware (tb, tn): biggest tiles that fit the per-core VMEM."""
    vmem = _vmem_capacity_bytes()
    # Budget for the (double-buffered) streaming x block — the only big operand.
    x_budget = max(8 << 20, vmem // 3)

    # Batch tile: large enough to amortize per-step overhead, but keep >=2 steps
    # on the 'parallel' axis when a second TensorCore exists (v7x megacore).
    tb_cap = min(B, 64)
    if _num_tensorcores() >= 2 and B >= 2:
        tb_cap = min(tb_cap, max(1, B // 2))
    tb = _largest_divisor_leq(B, tb_cap)

    def pick_tn(tb_):
        cap = x_budget // (2 * tb_ * C * x_itemsize)
        cap = (cap // 8) * 8
        if cap >= N:
            return N
        if cap < 8:
            return None
        for tn_ in range(cap, 7, -8):
            if N % tn_ == 0:
                return tn_
        # TODO(synk): N with no 8-multiple divisor (e.g. prime 197) falls back to
        # a whole-sequence tile; padding/masking the tail chunk would do better.
        return N

    tn = pick_tn(tb)
    while tn is None and tb > 1:
        tb = _largest_divisor_leq(B, tb - 1)
        tn = pick_tn(tb)
    if tn is None:
        tn = N
    return tb, tn, vmem


# ------------------------------- wrapper --------------------------------------

def highway_classifier(processed_embeddings, cls_embeddings, w=None, b=None,
                       *, tb=None, tn=None, out_dtype=jnp.float32):
    """
    processed_embeddings: (B, N, C) tokens
    cls_embeddings:       (B, C)    CLS embedding added to the pooled tokens
    w: (num_classes, C) or None     nn.Linear weight (None => nn.Identity head)
    b: (num_classes,)   or None     nn.Linear bias
    returns: (B, num_classes) logits, or (B, C) for the Identity head.
    """
    B, N, C = processed_embeddings.shape
    x_itemsize = processed_embeddings.dtype.itemsize

    if tb is None or tn is None:
        tb_auto, tn_auto, vmem = _choose_tiles(B, N, C, x_itemsize)
        tb = tb_auto if tb is None else tb
        tn = tn_auto if tn is None else tn
    else:
        vmem = _vmem_capacity_bytes()
    assert B % tb == 0
    assert N % tn == 0 and (tn == N or tn % 8 == 0)

    n_seq_chunks = N // tn
    inv_n = 1.0 / N
    cls3 = cls_embeddings.reshape(B, 1, C)

    # Streaming x block; triple-buffer when the sequence is chunked (pure DMA).
    x_blk_bytes = tb * tn * C * x_itemsize
    x_index = lambda i, k: (i, k, 0)
    use_tribuf = (n_seq_chunks >= 3) and (3 * x_blk_bytes + (8 << 20) < vmem)
    if use_tribuf:
        x_spec = pl.BlockSpec((tb, tn, C), x_index, pipeline_mode=pl.Buffered(3))
        n_x_bufs = 3
    else:
        x_spec = pl.BlockSpec((tb, tn, C), x_index)
        n_x_bufs = 2

    identity_head = w is None
    if identity_head:
        Kp = C
        operands = (processed_embeddings, cls3)
        in_specs = [x_spec,
                    pl.BlockSpec((tb, 1, C), lambda i, k: (i, 0, 0))]
        kernel = functools.partial(_pool_residual_kernel, inv_n)
        resident = 2 * tb * C * cls3.dtype.itemsize
    else:
        K = w.shape[0]
        Kp = ((K + 127) // 128) * 128                 # lane-dense output / MXU N
        wt = jnp.pad(w.T, ((0, 0), (0, Kp - K)))      # (C, Kp), folded once
        b2 = jnp.pad(b, (0, Kp - K))[None, :]         # (1, Kp)
        operands = (processed_embeddings, cls3, wt, b2)
        in_specs = [x_spec,
                    pl.BlockSpec((tb, 1, C), lambda i, k: (i, 0, 0)),
                    pl.BlockSpec((C, Kp), lambda i, k: (0, 0)),
                    pl.BlockSpec((1, Kp), lambda i, k: (0, 0))]
        kernel = functools.partial(_classifier_kernel, inv_n)
        resident = 2 * (C * Kp * wt.dtype.itemsize
                        + tb * C * cls3.dtype.itemsize
                        + Kp * b2.dtype.itemsize)

    out_itemsize = jnp.dtype(out_dtype).itemsize
    need = (n_x_bufs * x_blk_bytes + resident
            + 2 * tb * Kp * out_itemsize          # double-buffered output block
            + tb * C * 4)                         # f32 pooling accumulator
    vmem_limit = int(min(vmem - (4 << 20), max(need + (4 << 20), 32 << 20)))

    out3 = pl.pallas_call(
        kernel,
        out_shape=jax.ShapeDtypeStruct((B, 1, Kp), out_dtype),
        grid_spec=pltpu.PrefetchScalarGridSpec(
            num_scalar_prefetch=0,
            grid=(B // tb, n_seq_chunks),
            in_specs=in_specs,
            out_specs=pl.BlockSpec((tb, 1, Kp), lambda i, k: (i, 0, 0)),
            scratch_shapes=[pltpu.VMEM((tb, C), jnp.float32)],
        ),
        compiler_params=pltpu.CompilerParams(
            dimension_semantics=("parallel", "arbitrary"),
            vmem_limit_bytes=vmem_limit),
    )(*operands)

    if identity_head:
        return out3[:, 0, :]
    return out3[:, 0, :w.shape[0]]


# ------------------------------ reference ------------------------------------

def _reference(x, cls, w=None, b=None):
    pooled = jnp.mean(x, axis=1)              # AdaptiveAvgPool1d(1) over sequence
    if w is None:
        return pooled + cls
    return (pooled + cls) @ w.T + b


if __name__ == "__main__":
    # Small shapes consistent with the module: embed_depth = 128, num_classes = 10,
    # batch B = 2, sequence length N = 8.
    B, N, C, K = 2, 8, 128, 10

    key = jax.random.PRNGKey(0)
    k1, k2, k3, k4 = jax.random.split(key, 4)
    x = jax.random.normal(k1, (B, N, C), jnp.float32)        # processed_embeddings
    cls = jax.random.normal(k2, (B, C), jnp.float32)          # cls_embeddings
    w = jax.random.normal(k3, (K, C), jnp.float32) * 0.05     # Linear weight
    b = jax.random.normal(k4, (K,), jnp.float32) * 0.05       # Linear bias

    out = jax.block_until_ready(highway_classifier(x, cls, w, b))
    ref = _reference(x, cls, w, b)
    assert out.shape == (B, K)
    assert jnp.allclose(out, ref, atol=1e-4, rtol=1e-4), (
        f"max abs err {jnp.max(jnp.abs(out - ref))}")

    # num_classes <= 0 branch (nn.Identity head).
    out_id = jax.block_until_ready(highway_classifier(x, cls))
    ref_id = _reference(x, cls)
    assert out_id.shape == (B, C)
    assert jnp.allclose(out_id, ref_id, atol=1e-4, rtol=1e-4), (
        f"max abs err {jnp.max(jnp.abs(out_id - ref_id))}")

    print("KERNEL_OK")
</pallas_src>

<mosaic_0001>
module attributes {stable_mosaic.version = 11 : i64} {
  func.func @_classifier_kernel(%arg0: i32, %arg1: i32, %arg2: memref<2x8x128xf32, #tpu.memory_space<vmem>>, %arg3: memref<2x1x128xf32, #tpu.memory_space<vmem>>, %arg4: memref<128x128xf32, #tpu.memory_space<vmem>>, %arg5: memref<1x128xf32, #tpu.memory_space<vmem>>, %arg6: memref<2x1x128xf32, #tpu.memory_space<vmem>>, %arg7: memref<2x128xf32, #tpu.memory_space<vmem>>) attributes {dimension_semantics = [#tpu.dimension_semantics<parallel>, #tpu.dimension_semantics<arbitrary>], iteration_bounds = array<i64: 1, 1>, scalar_prefetch = 0 : i64, scratch_operands = 1 : i64, tpu.core_type = #tpu.core_type<tc>, window_params = [{transform_indices = @transform_0, window_bounds = array<i64: 2, 8, 128>}, {transform_indices = @transform_1, window_bounds = array<i64: 2, 1, 128>}, {pipeline_mode = #tpu.pipeline_mode<synchronous>, transform_indices = @transform_2, window_bounds = array<i64: 128, 128>}, {pipeline_mode = #tpu.pipeline_mode<synchronous>, transform_indices = @transform_3, window_bounds = array<i64: 1, 128>}, {transform_indices = @transform_4, window_bounds = array<i64: 2, 1, 128>}]} {
    %c0_i32 = arith.constant 0 : i32
    %0 = arith.cmpi eq, %arg1, %c0_i32 : i32
    %1 = arith.extui %0 : i1 to i32
    %c0_i32_0 = arith.constant 0 : i32
    %2 = arith.cmpi ne, %1, %c0_i32_0 : i32
    scf.if %2 {
      %cst_9 = arith.constant 0.000000e+00 : f32
      %11 = vector.broadcast %cst_9 : f32 to vector<2x128xf32>
      %c0_10 = arith.constant 0 : index
      %c0_11 = arith.constant 0 : index
      %12 = vector.load %arg7[%c0_10, %c0_11] : memref<2x128xf32, #tpu.memory_space<vmem>>, vector<2x128xf32>
      tpu.vector_store %arg7[%c0_10, %c0_11], %11 {strides = array<i32>} : memref<2x128xf32, #tpu.memory_space<vmem>>, vector<2x128xf32>,
    } else {
    }
    %c0 = arith.constant 0 : index
    %c0_1 = arith.constant 0 : index
    %3 = vector.load %arg7[%c0, %c0_1] : memref<2x128xf32, #tpu.memory_space<vmem>>, vector<2x128xf32>
    %c0_2 = arith.constant 0 : index
    %c0_3 = arith.constant 0 : index
    %c0_4 = arith.constant 0 : index
    %4 = vector.load %arg2[%c0_2, %c0_3, %c0_4] : memref<2x8x128xf32, #tpu.memory_space<vmem>>, vector<2x8x128xf32>
    %cst = arith.constant dense<0.000000e+00> : vector<2x128xf32>
    %5 = vector.multi_reduction <add>, %4, %cst [1] : vector<2x8x128xf32> to vector<2x128xf32>
    %6 = arith.addf %3, %5 : vector<2x128xf32>
    %c0_5 = arith.constant 0 : index
    %c0_6 = arith.constant 0 : index
    %7 = vector.load %arg7[%c0_5, %c0_6] : memref<2x128xf32, #tpu.memory_space<vmem>>, vector<2x128xf32>
    tpu.vector_store %arg7[%c0_5, %c0_6], %6 {strides = array<i32>} : memref<2x128xf32, #tpu.memory_space<vmem>>, vector<2x128xf32>,
    %c0_i32_7 = arith.constant 0 : i32
    %8 = arith.cmpi eq, %arg1, %c0_i32_7 : i32
    %9 = arith.extui %8 : i1 to i32
    %c0_i32_8 = arith.constant 0 : i32
    %10 = arith.cmpi ne, %9, %c0_i32_8 : i32
    scf.if %10 {
      %c0_9 = arith.constant 0 : index
      %c0_10 = arith.constant 0 : index
      %11 = vector.load %arg7[%c0_9, %c0_10] : memref<2x128xf32, #tpu.memory_space<vmem>>, vector<2x128xf32>
      %cst_11 = arith.constant 1.250000e-01 : f32
      %12 = vector.broadcast %cst_11 : f32 to vector<2x128xf32>
      %13 = arith.mulf %11, %12 : vector<2x128xf32>
      %c0_12 = arith.constant 0 : index
      %c0_13 = arith.constant 0 : index
      %c0_14 = arith.constant 0 : index
      %14 = vector.load %arg3[%c0_12, %c0_13, %c0_14] : memref<2x1x128xf32, #tpu.memory_space<vmem>>, vector<2x1x128xf32>
      %15 = vector.shape_cast %14 : vector<2x1x128xf32> to vector<2x128xf32>
      %16 = arith.addf %13, %15 : vector<2x128xf32>
      %c0_15 = arith.constant 0 : index
      %c0_16 = arith.constant 0 : index
      %17 = vector.load %arg4[%c0_15, %c0_16] : memref<128x128xf32, #tpu.memory_space<vmem>>, vector<128x128xf32>
      %cst_17 = arith.constant dense<0.000000e+00> : vector<2x128xf32>
      %18 = tpu.matmul %16, %17, %cst_17 {dimension_numbers = #tpu.dot_dimension_numbers<[1], [0], [0], [1], [0, 0, 1, 1], [], []>} : vector<2x128xf32>, vector<128x128xf32>, vector<2x128xf32> -> vector<2x128xf32>
      %c0_18 = arith.constant 0 : index
      %c0_19 = arith.constant 0 : index
      %19 = vector.load %arg5[%c0_18, %c0_19] : memref<1x128xf32, #tpu.memory_space<vmem>>, vector<1x128xf32>
      %20 = vector.broadcast %19 : vector<1x128xf32> to vector<2x128xf32>
      %21 = arith.addf %18, %20 : vector<2x128xf32>
      %22 = vector.shape_cast %21 : vector<2x128xf32> to vector<2x1x128xf32>
      %c0_20 = arith.constant 0 : index
      %c0_21 = arith.constant 0 : index
      %c0_22 = arith.constant 0 : index
      %23 = vector.load %arg6[%c0_20, %c0_21, %c0_22] : memref<2x1x128xf32, #tpu.memory_space<vmem>>, vector<2x1x128xf32>
      tpu.vector_store %arg6[%c0_20, %c0_21, %c0_22], %22 {strides = array<i32>} : memref<2x1x128xf32, #tpu.memory_space<vmem>>, vector<2x1x128xf32>,
    } else {
    }
    return
  }
  func.func @transform_0(%arg0: i32, %arg1: i32) -> (i32, i32, i32) {
    %c0_i32 = arith.constant 0 : i32
    %c0_i32_0 = arith.constant 0 : i32
    return %arg0, %arg1, %c0_i32 : i32, i32, i32
  }
  func.func @transform_1(%arg0: i32, %arg1: i32) -> (i32, i32, i32) {
    %c0_i32 = arith.constant 0 : i32
    %c0_i32_0 = arith.constant 0 : i32
    %c0_i32_1 = arith.constant 0 : i32
    return %arg0, %c0_i32, %c0_i32_0 : i32, i32, i32
  }
  func.func @transform_2(%arg0: i32, %arg1: i32) -> (i32, i32) {
    %c0_i32 = arith.constant 0 : i32
    %c0_i32_0 = arith.constant 0 : i32
    %c0_i32_1 = arith.constant 0 : i32
    return %c0_i32, %c0_i32_0 : i32, i32
  }
  func.func @transform_3(%arg0: i32, %arg1: i32) -> (i32, i32) {
    %c0_i32 = arith.constant 0 : i32
    %c0_i32_0 = arith.constant 0 : i32
    %c0_i32_1 = arith.constant 0 : i32
    return %c0_i32, %c0_i32_0 : i32, i32
  }
  func.func @transform_4(%arg0: i32, %arg1: i32) -> (i32, i32, i32) {
    %c0_i32 = arith.constant 0 : i32
    %c0_i32_0 = arith.constant 0 : i32
    %c0_i32_1 = arith.constant 0 : i32
    return %arg0, %c0_i32, %c0_i32_0 : i32, i32, i32
  }
}

</mosaic_0001>

<bundles_post_ra>
// kernel: tpu_custom_call.1
= control target key start
LH: loop header
LB: loop body
LE: loop exit
PB: predicated region body
PF: predicated region fallthrough
CT: control target
= control target key end

     0   :  { %9 = vsyncpa [#allocation4], 0  ;;  %s477_s0 = inlined_call_operand.hbm [shape: f32[2,8,128], index: 0, kind: input, shape index: {}]   ;;  %s478_s1 = inlined_call_operand.hbm [shape: f32[2,1,128], index: 1, kind: input, shape index: {}]   ;;  %s479_s2 = inlined_call_operand.hbm [shape: f32[128,128], index: 2, kind: input, shape index: {}]   ;;  %s480_s3 = inlined_call_operand.vmem [shape: f32[1,128], index: 3, kind: input, shape index: {}]   ;;  %s481_s4 = inlined_call_operand.hbm [shape: f32[2,1,128], index: 4, kind: output, shape index: {}]  }
   0x1   :  { %10 = vsyncpa [#allocation7], 0 }
   0x2   :  { %11 = vsyncpa [#allocation5], 0  ;;  %s402_s15 = smov [#allocation6]  }
   0x3   :  { %s29_s16 = sshll.u32 %s402_s15, 4  ;;  %s30_s16 = int_to_ptr.vmem [resolvable:$true] %s29_s16 }
   0x4   :  { %s324_s17 = scalar_lea.vmem %s30_s16, 32  ;;  %p329_p1 = scmp.lt.s32.totalorder %s30_s16, %s30_s16 }
   0x5   :  { %p325_p0 = scmp.ne.s32.totalorder %s30_s16, %s324_s17  ;;  %p330_p2 = scmp.lt.s32.totalorder %s324_s17, %s324_s17 }
   0x7   :  { %p331_p3 = por %p330_p2, %p329_p1 }
   0x9   :  { %p332_p4 = pnand %p331_p3, %p325_p0 }
   0xb   :  { %335 = shalt.err (!%p332_p4)
}
   0xc   :  { %s403_s18 = smov 16   ;;  %s404_s19 = smov 1  }
   0xd   :  { %35 = dma.hbm_to_vmem [thread:$0]  %s478_s1, 32, %s30_s16, [#allocation7], %s403_s18, %s403_s18, %s404_s19  }
   0xe   :  { %s405_s22 = smov [#allocation3]  }
   0xf   :  { %s17_s23 = sshll.u32 %s405_s22, 4  ;;  %s18_s23 = int_to_ptr.vmem [resolvable:$true] %s17_s23 }
  0x10   :  { %s344_s24 = scalar_lea.vmem %s18_s23, 256  ;;  %p349_p6 = scmp.lt.s32.totalorder %s18_s23, %s18_s23 }
  0x11   :  { %p345_p5 = scmp.ne.s32.totalorder %s18_s23, %s344_s24  ;;  %p350_p7 = scmp.lt.s32.totalorder %s344_s24, %s344_s24 }
  0x13   :  { %p351_p8 = por %p350_p7, %p349_p6 }
  0x15   :  { %p352_p9 = pnand %p351_p8, %p345_p5 }
  0x17   :  { %355 = shalt.err (!%p352_p9)
}
  0x18   :  { %s406_s25 = smov 128   ;;  %s407_s26 = smov 8  }
  0x19   :  { %23 = dma.hbm_to_vmem [thread:$0]  %s477_s0, 256, %s18_s23, [#allocation4], %s406_s25, %s406_s25, %s407_s26  }
  0x1a   :  { %s408_s29 = smov [#allocation8]  }
  0x1b   :  { %s41_s30 = sshll.u32 %s408_s29, 4  ;;  %s42_s30 = int_to_ptr.vmem [resolvable:$true] %s41_s30 }
  0x1c   :  { %s364_s1 = scalar_lea.vmem %s42_s30, 2048  ;;  %p369_p11 = scmp.lt.s32.totalorder %s42_s30, %s42_s30 }
  0x1d   :  { %p365_p10 = scmp.ne.s32.totalorder %s42_s30, %s364_s1  ;;  %p370_p12 = scmp.lt.s32.totalorder %s364_s1, %s364_s1 }
  0x1f   :  { %p371_p13 = por %p370_p12, %p369_p11 }
  0x21   :  { %p372_p0 = pnand %p371_p13, %p365_p10 }
  0x23   :  { %375 = shalt.err (!%p372_p0)
}
  0x24   :  { %47 = dma.hbm_to_vmem [thread:$0]  %s479_s2, 2048, %s42_s30, [#allocation7], %s406_s25, %s406_s25, %s407_s26  }
  0x25   :  { %396 = dma.done.wait [#allocation4], 256  }
  0x26   :  { %397 = vsyncadd [#allocation4], 4294967040 }
  0x27   :  { %398 = dma.done.wait [#allocation7], 2080  }
  0x28   :  { %399 = vsyncadd [#allocation7], 4294965216  ;;  %v409_v0 = vmov 0.0   ;;  %vm410_vm0 = vmmov 0   ;;  %v127_v1 = vld [vmem:[#allocation8 + $0x78] sm:$0xff]  ;;  %v126_v2 = vld [vmem:[#allocation8 + $0x70] sm:$0xff]  ;;  %v99_v20 = vlaneseq }
  0x29   :  { %270 = vmatprep.subr.mxu0 %v409_v0  ;;  %63 = vst [vmem:[#allocation2] sm:$0x3] %v409_v0  ;;  %302 = vmatprep.mubr.msk.f32.mxu0 %vm410_vm0, %v409_v0  ;;  %v125_v3 = vld [vmem:[#allocation8 + $0x68] sm:$0xff]  ;;  %v124_v4 = vld [vmem:[#allocation8 + $0x60] sm:$0xff]  ;;  %v123_v6 = vld [vmem:[#allocation8 + $0x58] sm:$0xff]  ;;  %vm81_vm1 = vcmask 1041409  }
  0x2a   :  { %271 = vmatpush3.msra.mxu0 %v127_v1  ;;  %v65_v5 = vld [vmem:[#allocation3] sm:$0xff]  ;;  %v66_v7 = vld [vmem:[#allocation3 + $0x8] sm:$0xff]  ;;  %v120_v16 = vld [vmem:[#allocation8 + $0x40] sm:$0xff]  ;;  %v411_v18 = vmov 1966171168   ;;  %v100_v28 = vshrl.u32 %v99_v20, 7 }
  0x2b   :  { %272 = vmatprep.subr.mxu0 %v409_v0  ;;  %v67_v8 = vrot.slane %v65_v5, 4  ;;  %v73_v9 = vrot.slane %v66_v7, 4  ;;  %v122_v10 = vld [vmem:[#allocation8 + $0x50] sm:$0xff]  ;;  %v121_v13 = vld [vmem:[#allocation8 + $0x48] sm:$0xff]  ;;  %v97_v19 = vunpack.c.l.s4 %v411_v18  ;;  %v119_v22 = vld [vmem:[#allocation8 + $0x38] sm:$0xff]  ;;  %s412_s7 = smov [#allocation9]  }
  0x2c   :  { %273 = vmatpush3.msra.mxu0 %v126_v2  ;;  %v118_v25 = vld [vmem:[#allocation8 + $0x30] sm:$0xff]  ;;  %v91_v31 = vld [vmem:[#allocation6] sm:$0x1]  ;;  %v92_v32 = vld [vmem:[#allocation6 + $0x1] sm:$0x1]  ;;  %s237_s8 = sshll.u32 %s412_s7, 4  ;;  %s238_s8 = int_to_ptr.vmem [resolvable:$true] %s237_s8 }
  0x2d   :  { %274 = vmatprep.subr.mxu0 %v409_v0  ;;  %v68_v11 = vadd.f32 %v67_v8, %v65_v5  ;;  %v74_v12 = vadd.f32 %v73_v9, %v66_v7  ;;  %v98_v27 = vunpack.c.0.s8 %v97_v19  ;;  %v117_v33 = vld [vmem:[#allocation8 + $0x28] sm:$0xff]  ;;  %v116_v35 = vld [vmem:[#allocation8 + $0x20] sm:$0xff]  ;;  %v95_v37 = vcombine.low %v91_v31, %v92_v32  ;;  %v115_v39 = vld [vmem:[#allocation8 + $0x18] sm:$0xff]  ;;  %s376_s9 = scalar_lea.vmem %s238_s8, 32  ;;  %p381_p2 = scmp.lt.s32.totalorder %s238_s8, %s238_s8 }
  0x2e   :  { %275 = vmatpush3.msra.mxu0 %v125_v3  ;;  %v114_v40 = vld [vmem:[#allocation8 + $0x10] sm:$0xff]  ;;  %v113_v42 = vld [vmem:[#allocation8 + $0x8] sm:$0xff]  ;;  %v112_v43 = vld [vmem:[#allocation8] sm:$0xff]  ;;  %p377_p1 = scmp.ne.s32.totalorder %s238_s8, %s376_s9  ;;  %p382_p3 = scmp.lt.s32.totalorder %s376_s9, %s376_s9 }
  0x2f   :  { %276 = vmatprep.subr.mxu0 %v409_v0  ;;  %v69_v14 = vrot.slane %v68_v11, 2  ;;  %v75_v15 = vrot.slane %v74_v12, 2  ;;  %v101_v38 = vsub.s32 %v98_v27, %v100_v28  ;;  %v250_v48 = vld [vmem:[%s480_s3] ss:$0 sm:$0xff] }
  0x30   :  { %277 = vmatpush3.msra.mxu0 %v124_v4  ;;  %v64_v29 = vld [vmem:[#allocation2] sm:$0x3]  ;;  %p383_p4 = por %p382_p3, %p381_p2 }
  0x31   :  { %278 = vmatprep.subr.mxu0 %v409_v0  ;;  %v70_v17 = vadd.f32 %v69_v14, %v68_v11  ;;  %v76_v21 = vadd.f32 %v75_v15, %v74_v12  ;;  %v102_v41 = vrot.slane %v95_v37, %v101_v38 }
  0x32   :  { %279 = vmatpush3.msra.mxu0 %v123_v6  ;;  %p384_p5 = pnand %p383_p4, %p377_p1 }
  0x33   :  { %280 = vmatprep.subr.mxu0 %v409_v0  ;;  %v71_v23 = vrot.slane %v70_v17, 1  ;;  %v77_v24 = vrot.slane %v76_v21, 1  ;;  %v109_v44 = vrot.slane %v102_v41, %v101_v38 }
  0x34   :  { %281 = vmatpush3.msra.mxu0 %v122_v10 }
  0x35   :  { %282 = vmatprep.subr.mxu0 %v409_v0  ;;  %v72_v26 = vadd.f32 %v71_v23, %v70_v17  ;;  %v78_v30 = vadd.f32 %v77_v24, %v76_v21 }
  0x36   :  { %283 = vmatpush3.msra.mxu0 %v121_v13 }
  0x37   :  { %284 = vmatprep.subr.mxu0 %v409_v0  ;;  %v82_v34 = vsel %vm81_vm1, %v78_v30, %v72_v26 }
  0x38   :  { %285 = vmatpush3.msra.mxu0 %v120_v16  ;;  %v84_v36 = vadd.f32 %v82_v34, %v64_v29 }
  0x39   :  { %286 = vmatprep.subr.mxu0 %v409_v0 }
  0x3a   :  { %287 = vmatpush3.msra.mxu0 %v119_v22  ;;  %85 = vst [vmem:[#allocation2] sm:$0x3] %v84_v36 }
  0x3b   :  { %288 = vmatprep.subr.mxu0 %v409_v0 }
  0x3c   :  { %289 = vmatpush3.msra.mxu0 %v118_v25 }
  0x3d   :  { %290 = vmatprep.subr.mxu0 %v409_v0 }
  0x3e   :  { %291 = vmatpush3.msra.mxu0 %v117_v33 }
  0x3f   :  { %292 = vmatprep.subr.mxu0 %v409_v0 }
  0x40   :  { %293 = vmatpush3.msra.mxu0 %v116_v35 }
  0x41   :  { %294 = vmatprep.subr.mxu0 %v409_v0  ;;  %v89_v45 = vld [vmem:[#allocation2] sm:$0x3] }
  0x42   :  { %295 = vmatpush3.msra.mxu0 %v115_v39  ;;  %v90_v46 = vmul.f32 0.125, %v89_v45 }
  0x43   :  { %296 = vmatprep.subr.mxu0 %v409_v0 }
  0x44   :  { %297 = vmatpush3.msra.mxu0 %v114_v40  ;;  %v111_v47 = vadd.f32 %v109_v44, %v90_v46 }
  0x45   :  { %298 = vmatprep.subr.mxu0 %v409_v0 }
  0x46   :  { %299 = vmatpush3.msra.mxu0 %v113_v42 }
  0x47   :  { %300 = vmatprep.subr.mxu0 %v409_v0 }
  0x48   :  { %301 = vmatpush3.msra.mxu0 %v112_v43 }
  0x49   :  { %303 = vmatmul.mubr.f32.vlgmr.msra.gmra.mxu0 %v111_v47 }
 0x109   :  { %v201_v49 = vpop.f32.mrf.mxu0 }
 0x10a   :  { %v202_v50 = vadd.f32 %v250_v48, %v201_v49 }
 0x10b   :  { %v304_v51 = vpop.f32.mrf.mxu0 }
 0x10c   :  { %v212_v52 = vrot.slane %v202_v50, %v101_v38 }
 0x10e   :  { %v213_v53 = vcombine.high %v212_v52, %v212_v52  ;;  %251 = vst.sshfl [vmem:[#allocation9] sm:$0x1 pattern:$0x73625140] %v212_v52 }
 0x110   :  { %252 = vst.sshfl [vmem:[#allocation9 + $0x1] sm:$0x1 pattern:$0x73625140] %v213_v53 }
 0x111   :  { %387 = shalt.err (!%p384_p5)
}
 0x112   :  { %243 = dma.vmem_to_hbm [thread:$0]  %s238_s8, 32, %s481_s4, [#allocation5], %s403_s18, %s403_s18, %s404_s19  }
 0x113   :  { %400 = dma.done.wait [#allocation5], 32  }
 0x114   :  { %401 = vsyncadd [#allocation5], 4294967264 }
 0x115   :  { %247 = vsyncpa [#allocation4], 1 }
 0x116   :  { %248 = vsyncpa [#allocation7], 1 }
 0x117   :  { %249 = vsyncpa [#allocation5], 1 }

</bundles_post_ra>
